<compile_context>
chip_gen: v6e
topology: v6e:2x2x1
jax: 0.10.0
libtpu: 0.0.40
codegen_flags: <defaults>
</compile_context>

<pallas_src>
import math

import jax
import jax.numpy as jnp
from jax.experimental import pallas as pl
from jax.experimental.pallas import tpu as pltpu

_LANES = 128
_MAX_TILE_COLS = 1024            # multiple of 128 -> lane-dense, unmasked vst
_MAX_TILE_ROWS = 1024            # 1024x1024 f32 = 4 MiB per buffer
_SPLIT_BYTES = 4 * 1024 * 1024   # above this, force >= 2 grid steps (v7x: 2 TCs)
_VMEM_LIMIT = 48 * 1024 * 1024   # <= v7x 64 MiB physical; v5e/v6e have 128 MiB


def _round_up(x: int, m: int) -> int:
    return ((x + m - 1) // m) * m


def _sublane_unit(*dtypes) -> int:
    # Sub-32-bit dtypes pack along sublanes: f32 -> 8, bf16 -> 16, i8/fp8 -> 32.
    unit = 8
    for dt in dtypes:
        unit = max(unit, 8 * (4 // max(1, jnp.dtype(dt).itemsize)))
    return unit


def _residual_add_kernel(fx_ref, res_ref, o_ref):
    # Pure VPU elementwise add in the promoted dtype; cast only at the store.
    o_ref[...] = (fx_ref[...] + res_ref[...]).astype(o_ref.dtype)


def _choose_tile_rows(rows: int, cols: int, max_itemsize: int, sub: int) -> int:
    if rows <= sub:
        return rows                      # single full-extent block (always legal)
    tile_rows = min(_MAX_TILE_ROWS, _round_up(rows, sub))
    if tile_rows >= rows:
        tile_rows = rows                 # one block, exact full dims
    # v7x megacore: make sure mid/large arrays produce >= 2 parallel grid steps
    # so both TensorCores (and both HBM paths) are used.
    if rows * cols * max_itemsize > _SPLIT_BYTES and pl.cdiv(rows, tile_rows) < 2:
        tile_rows = max(sub, _round_up(pl.cdiv(rows, 2), sub))
    return tile_rows


def _run_add_2d(fx2, res2, out_dtype, tile_rows):
    rows, cols = fx2.shape
    block = (tile_rows, cols)
    n_bytes = rows * cols * (jnp.dtype(fx2.dtype).itemsize
                             + jnp.dtype(res2.dtype).itemsize
                             + jnp.dtype(out_dtype).itemsize)
    cost = pl.CostEstimate(flops=rows * cols, transcendentals=0,
                           bytes_accessed=n_bytes)
    return pl.pallas_call(
        _residual_add_kernel,
        out_shape=jax.ShapeDtypeStruct((rows, cols), out_dtype),
        grid_spec=pltpu.PrefetchScalarGridSpec(
            num_scalar_prefetch=0,
            grid=(pl.cdiv(rows, tile_rows),),
            in_specs=[
                pl.BlockSpec(block, lambda r: (r, 0)),
                pl.BlockSpec(block, lambda r: (r, 0)),
            ],
            out_specs=pl.BlockSpec(block, lambda r: (r, 0)),
        ),
        compiler_params=pltpu.CompilerParams(
            dimension_semantics=("parallel",),
            vmem_limit_bytes=_VMEM_LIMIT,
        ),
        cost_estimate=cost,
        # fn(x) is a dead intermediate after the add; reuse its HBM buffer.
        input_output_aliases={0: 0},
    )(fx2, res2)


def residual_add(fn, x: jnp.ndarray, **kwargs) -> jnp.ndarray:
    """Pallas equivalent of ResidualAdd.forward: returns fn(x, **kwargs) + x."""
    # TODO(synk): `fn` is an arbitrary nn.Module in the PyTorch spec; it runs as
    # plain JAX here.  When fn ends in a matmul, fusing the residual into that
    # producer's epilogue would remove ~2/3 of this kernel's HBM traffic.
    fx = fn(x, **kwargs)
    assert fx.shape == x.shape, "ResidualAdd requires fn to preserve the shape"

    orig_shape = x.shape
    out_dtype = fx.dtype                 # PyTorch: in-place add into fn's output
    n_elems = x.size
    sub = _sublane_unit(fx.dtype, x.dtype)
    max_itemsize = max(jnp.dtype(fx.dtype).itemsize, jnp.dtype(x.dtype).itemsize)

    if fx is x:
        # Identity fn: never alias the caller's own buffer into the output.
        fx = fx + jnp.zeros((), dtype=fx.dtype)

    if n_elems % _LANES == 0:
        # Fast path: free reshape to a lane-dense slab; no padding copies and
        # no output slice.
        cols = _LANES * math.gcd(n_elems // _LANES, _MAX_TILE_COLS // _LANES)
        rows = n_elems // cols
        tile_rows = _choose_tile_rows(rows, cols, max_itemsize, sub)
        out2 = _run_add_2d(fx.reshape(rows, cols), x.reshape(rows, cols),
                           out_dtype, tile_rows)
        return out2.reshape(orig_shape)

    # Fallback for odd element counts: pad both operands to a lane-dense slab.
    cols = min(_MAX_TILE_COLS, _round_up(pl.cdiv(n_elems, sub), _LANES))
    rows = pl.cdiv(n_elems, cols)
    pad = rows * cols - n_elems

    def _to_2d(a):
        return jnp.pad(a.reshape(-1), (0, pad)).reshape(rows, cols)

    tile_rows = _choose_tile_rows(rows, cols, max_itemsize, sub)
    out2 = _run_add_2d(_to_2d(fx), _to_2d(x), out_dtype, tile_rows)
    return out2.reshape(-1)[:n_elems].reshape(orig_shape)


def residual_add_ref(fn, x: jnp.ndarray, **kwargs) -> jnp.ndarray:
    return fn(x, **kwargs) + x


if __name__ == "__main__":
    # Small shapes consistent with the module's transformer usage:
    # x of shape (seq, batch, hidden); fn = a tiny feed-forward sub-module.
    SEQ, BATCH, HIDDEN, FF = 8, 4, 32, 64

    key = jax.random.PRNGKey(0)
    kx, kw1, kw2, kx2, kx3 = jax.random.split(key, 5)

    # Case 1: aligned f32 (fast path, no padding copies, no output slice).
    x = jax.random.normal(kx, (SEQ, BATCH, HIDDEN), dtype=jnp.float32)
    w1 = jax.random.normal(kw1, (HIDDEN, FF), dtype=jnp.float32) * 0.05
    w2 = jax.random.normal(kw2, (FF, HIDDEN), dtype=jnp.float32) * 0.05

    def ff(v):
        return jax.nn.gelu(v @ w1) @ w2

    out = jax.block_until_ready(residual_add(ff, x))
    ref = residual_add_ref(ff, x)
    assert out.shape == x.shape and out.dtype == ref.dtype
    assert jnp.allclose(out, ref, atol=1e-6, rtol=1e-6)

    # Case 2: odd element count -> padded fallback path.
    x_odd = jax.random.normal(kx2, (5, 3, 7), dtype=jnp.float32)
    out_odd = jax.block_until_ready(residual_add(jnp.tanh, x_odd))
    ref_odd = residual_add_ref(jnp.tanh, x_odd)
    assert out_odd.shape == x_odd.shape
    assert jnp.allclose(out_odd, ref_odd, atol=1e-6, rtol=1e-6)

    # Case 3: bf16 (sublane-aware tiling for packed dtypes).
    x_bf = jax.random.normal(kx3, (4, 8, 128), dtype=jnp.bfloat16)
    scale2 = lambda v: v * 2
    out_bf = jax.block_until_ready(residual_add(scale2, x_bf))
    ref_bf = residual_add_ref(scale2, x_bf)
    assert out_bf.dtype == jnp.bfloat16 and out_bf.shape == x_bf.shape
    assert jnp.allclose(out_bf.astype(jnp.float32), ref_bf.astype(jnp.float32),
                        atol=1e-2, rtol=1e-2)

    print("KERNEL_OK")
</pallas_src>

<mosaic_0001>
module attributes {stable_mosaic.version = 11 : i64} {
  func.func @_residual_add_kernel(%arg0: i32, %arg1: memref<1x1024xf32, #tpu.memory_space<vmem>>, %arg2: memref<1x1024xf32, #tpu.memory_space<vmem>>, %arg3: memref<1x1024xf32, #tpu.memory_space<vmem>>) attributes {dimension_semantics = [#tpu.dimension_semantics<parallel>], iteration_bounds = array<i64: 1>, scalar_prefetch = 0 : i64, scratch_operands = 0 : i64, tpu.core_type = #tpu.core_type<tc>, window_params = [{transform_indices = @transform_0, window_bounds = array<i64: 1, 1024>}, {transform_indices = @transform_1, window_bounds = array<i64: 1, 1024>}, {transform_indices = @transform_2, window_bounds = array<i64: 1, 1024>}]} {
    %c0 = arith.constant 0 : index
    %c0_0 = arith.constant 0 : index
    %0 = vector.load %arg1[%c0, %c0_0] : memref<1x1024xf32, #tpu.memory_space<vmem>>, vector<1x1024xf32>
    %c0_1 = arith.constant 0 : index
    %c0_2 = arith.constant 0 : index
    %1 = vector.load %arg2[%c0_1, %c0_2] : memref<1x1024xf32, #tpu.memory_space<vmem>>, vector<1x1024xf32>
    %2 = arith.addf %0, %1 : vector<1x1024xf32>
    %c0_3 = arith.constant 0 : index
    %c0_4 = arith.constant 0 : index
    %3 = vector.load %arg3[%c0_3, %c0_4] : memref<1x1024xf32, #tpu.memory_space<vmem>>, vector<1x1024xf32>
    tpu.vector_store %arg3[%c0_3, %c0_4], %2 {strides = array<i32>} : memref<1x1024xf32, #tpu.memory_space<vmem>>, vector<1x1024xf32>,
    return
  }
  func.func @transform_0(%arg0: i32) -> (i32, i32) {
    %c0_i32 = arith.constant 0 : i32
    %c0_i32_0 = arith.constant 0 : i32
    return %arg0, %c0_i32 : i32, i32
  }
  func.func @transform_1(%arg0: i32) -> (i32, i32) {
    %c0_i32 = arith.constant 0 : i32
    %c0_i32_0 = arith.constant 0 : i32
    return %arg0, %c0_i32 : i32, i32
  }
  func.func @transform_2(%arg0: i32) -> (i32, i32) {
    %c0_i32 = arith.constant 0 : i32
    %c0_i32_0 = arith.constant 0 : i32
    return %arg0, %c0_i32 : i32, i32
  }
}

</mosaic_0001>

<bundles_post_ra>
// kernel: tpu_custom_call.1
= control target key start
LH: loop header
LB: loop body
LE: loop exit
PB: predicated region body
PF: predicated region fallthrough
CT: control target
= control target key end

     0   :  { %7 = vsyncpa [#allocation3], 0  ;;  %s115_s0 = inlined_call_operand.hbm [shape: f32[1,1024], index: 0, kind: input, shape index: {}, may-alias: {0,2}]   ;;  %s116_s1 = inlined_call_operand.vmem [shape: f32[1,1024], index: 1, kind: input, shape index: {}]   ;;  %s117_s2 = inlined_call_operand.hbm [shape: f32[1,1024], index: 2, kind: output, shape index: {}, may-alias: {0,2}]  }
   0x1   :  { %8 = vsyncpa [#allocation4], 0  ;;  %s89_s9 = smov [#allocation2]  }
   0x2   :  { %s15_s10 = sshll.u32 %s89_s9, 4  ;;  %s16_s10 = int_to_ptr.vmem [resolvable:$true] %s15_s10 }
   0x3   :  { %s53_s11 = scalar_lea.vmem %s16_s10, 128  ;;  %p58_p1 = scmp.lt.s32.totalorder %s16_s10, %s16_s10 }
   0x4   :  { %p54_p0 = scmp.ne.s32.totalorder %s16_s10, %s53_s11  ;;  %p59_p2 = scmp.lt.s32.totalorder %s53_s11, %s53_s11 }
   0x6   :  { %p60_p3 = por %p59_p2, %p58_p1 }
   0x8   :  { %p61_p4 = pnand %p60_p3, %p54_p0 }
   0xa   :  { %64 = shalt.err (!%p61_p4)
}
   0xb   :  { %18 = dma.hbm_to_vmem [thread:$0]  %s115_s0, 128, %s16_s10, [#allocation3]  }
   0xc   :  { %85 = dma.done.wait [#allocation3], 128  }
   0xd   :  { %86 = vsyncadd [#allocation3], 4294967168  ;;  %s90_s14 = smov [#allocation5]   ;;  %v24_v0 = vld [vmem:[#allocation2] sm:$0xff] }
   0xe   :  { %s34_s15 = sshll.u32 %s90_s14, 4  ;;  %v25_v1 = vld [vmem:[%s116_s1] sm:$0xff]  ;;  %s35_s15 = int_to_ptr.vmem [resolvable:$true] %s34_s15 }
   0xf   :  { %v26_v2 = vadd.f32 %v25_v1, %v24_v0  ;;  %s65_s18 = scalar_lea.vmem %s35_s15, 128  ;;  %p70_p6 = scmp.lt.s32.totalorder %s35_s15, %s35_s15 }
  0x10   :  { %p66_p5 = scmp.ne.s32.totalorder %s35_s15, %s65_s18  ;;  %p71_p7 = scmp.lt.s32.totalorder %s65_s18, %s65_s18 }
  0x11   :  { %27 = vst [vmem:[#allocation5] sm:$0xff] %v26_v2 }
  0x12   :  { %p72_p8 = por %p71_p7, %p70_p6 }
  0x14   :  { %p73_p9 = pnand %p72_p8, %p66_p5 }
  0x16   :  { %76 = shalt.err (!%p73_p9)
}
  0x17   :  { %37 = dma.vmem_to_hbm [thread:$0]  %s35_s15, 128, %s117_s2, [#allocation4]  }
  0x18   :  { %87 = dma.done.wait [#allocation4], 128  }
  0x19   :  { %88 = vsyncadd [#allocation4], 4294967168 }
  0x1a   :  { %41 = vsyncpa [#allocation3], 1 }
  0x1b   :  { %42 = vsyncpa [#allocation4], 1 }

</bundles_post_ra>
